<compile_context>
chip_gen: v7x
topology: tpu7x:2x2x1
jax: 0.10.0
libtpu: 0.0.40
codegen_flags: <defaults>
</compile_context>

<pallas_src>
import jax
import jax.numpy as jnp
from jax import lax
from jax.experimental import pallas as pl
from jax.experimental.pallas import tpu as pltpu


def fc_sigmoid_kernel(x_ref, w_ref, b_ref, o_ref, acc_ref):
    # x_ref: (TM, TK)   activation tile
    # w_ref: (TN, TK)   weight tile in PyTorch layout (contract over K = dim 1)
    # b_ref: (1, TN)    bias tile
    # o_ref: (TM, TN)   output tile
    # acc_ref: (TM, TN) f32 accumulator (persists across the K grid axis)
    k = pl.program_id(2)

    @pl.when(k == 0)
    def _init():
        # Fold the bias into the accumulator init (saves one VPU add later).
        acc_ref[...] = jnp.broadcast_to(
            b_ref[...].astype(jnp.float32), acc_ref.shape)

    # x (TM, TK) · W (TN, TK) contracted over K  ->  (TM, TN), f32 accumulate.
    acc_ref[...] += lax.dot_general(
        x_ref[...], w_ref[...],
        dimension_numbers=(((1,), (1,)), ((), ())),
        preferred_element_type=jnp.float32)

    @pl.when(k == pl.num_programs(2) - 1)
    def _finalize():
        z = acc_ref[...]
        # sigmoid(z) = 1 / (1 + exp(-z)); exp and approx reciprocal go to the EUP.
        sig = pl.reciprocal(1.0 + jnp.exp(-z), approx=True)
        o_ref[...] = sig.astype(o_ref.dtype)


def _pick_tile(dim, pref):
    """Preferred tile if it divides the dim exactly, else the full extent.

    Both choices satisfy the TPU (8, 128) block constraint: `pref` is a
    multiple of 8/128, and a full-extent block is always legal.
    """
    return pref if dim % pref == 0 else dim


def fc_sigmoid(x, weight, bias, *, tm=256, tn=256, tk=512):
    """x: (..., D_in), weight: (D_out, D_in) [PyTorch layout], bias: (D_out,)."""
    d_in = x.shape[-1]
    d_out, d_in_w = weight.shape
    assert d_in_w == d_in, "weight shape must be (d_out, d_in)"

    lead_shape = x.shape[:-1]
    x2 = x.reshape(-1, d_in)
    B = x2.shape[0]

    TM = _pick_tile(B, tm)       # batch tile  (pref 256, multiple of 8)
    TN = _pick_tile(d_out, tn)   # output tile (pref 256, multiple of 128 -> lane-dense)
    TK = _pick_tile(d_in, tk)    # reduce tile (pref 512)

    b2 = bias.reshape(1, d_out)
    grid = (B // TM, d_out // TN, d_in // TK)

    itemsize = x2.dtype.itemsize
    cost = pl.CostEstimate(
        flops=2 * B * d_in * d_out,
        transcendentals=B * d_out,
        bytes_accessed=(B * d_in * itemsize
                        + d_out * d_in * weight.dtype.itemsize
                        + d_out * bias.dtype.itemsize
                        + B * d_out * itemsize))

    out = pl.pallas_call(
        fc_sigmoid_kernel,
        out_shape=jax.ShapeDtypeStruct((B, d_out), x.dtype),
        grid_spec=pltpu.PrefetchScalarGridSpec(
            num_scalar_prefetch=0,
            grid=grid,
            in_specs=[
                pl.BlockSpec((TM, TK), lambda i, j, k: (i, k)),   # x tile
                pl.BlockSpec((TN, TK), lambda i, j, k: (j, k)),   # W tile (PyTorch layout)
                pl.BlockSpec((1, TN), lambda i, j, k: (0, j)),    # bias tile
            ],
            out_specs=pl.BlockSpec((TM, TN), lambda i, j, k: (i, j)),
            scratch_shapes=[pltpu.VMEM((TM, TN), jnp.float32)],
        ),
        compiler_params=pltpu.CompilerParams(
            dimension_semantics=("parallel", "parallel", "arbitrary")),
        cost_estimate=cost,
    )(x2, weight, b2)

    return out.reshape(*lead_shape, d_out)


def _reference(x, weight, bias):
    return jax.nn.sigmoid(x @ weight.T + bias)


if __name__ == "__main__":
    key = jax.random.PRNGKey(0)

    # --- Toy case matching the module defaults (input_size=2, output_size=3) ---
    input_size, output_size, batch = 2, 3, 8
    kx, kw, kb, k2 = jax.random.split(key, 4)

    bound = 1.0 / jnp.sqrt(jnp.float32(input_size))
    weight = jax.random.uniform(kw, (output_size, input_size), jnp.float32,
                                minval=-bound, maxval=bound)
    bias = jax.random.uniform(kb, (output_size,), jnp.float32,
                              minval=-bound, maxval=bound)
    x = jax.random.normal(kx, (batch, input_size), jnp.float32)

    out = jax.block_until_ready(fc_sigmoid(x, weight, bias))
    ref = _reference(x, weight, bias)
    assert out.shape == (batch, output_size)
    assert jnp.allclose(out, ref, atol=2e-3, rtol=2e-3), "toy case mismatch"

    # --- Larger case exercising the real (M, N, K) tiled pipeline ---
    B2, D_in2, D_out2 = 512, 1024, 512        # grid = (2, 2, 2)
    ka, kwe, kbi = jax.random.split(k2, 3)
    x_big = jax.random.normal(ka, (B2, D_in2), jnp.float32) * 0.1
    w_big = jax.random.normal(kwe, (D_out2, D_in2), jnp.float32) * 0.02
    b_big = jax.random.normal(kbi, (D_out2,), jnp.float32) * 0.1

    out_big = jax.block_until_ready(fc_sigmoid(x_big, w_big, b_big))
    ref_big = _reference(x_big, w_big, b_big)
    assert out_big.shape == (B2, D_out2)
    assert jnp.allclose(out_big, ref_big, atol=2e-3, rtol=2e-3), "tiled case mismatch"

    print("KERNEL_OK")
</pallas_src>

<mosaic_0001>
module attributes {stable_mosaic.version = 11 : i64} {
  func.func @fc_sigmoid_kernel(%arg0: i32, %arg1: i32, %arg2: i32, %arg3: memref<8x2xf32, #tpu.memory_space<vmem>>, %arg4: memref<3x2xf32, #tpu.memory_space<vmem>>, %arg5: memref<1x3xf32, #tpu.memory_space<vmem>>, %arg6: memref<8x3xf32, #tpu.memory_space<vmem>>, %arg7: memref<8x3xf32, #tpu.memory_space<vmem>>) attributes {dimension_semantics = [#tpu.dimension_semantics<parallel>, #tpu.dimension_semantics<parallel>, #tpu.dimension_semantics<arbitrary>], iteration_bounds = array<i64: 1, 1, 1>, scalar_prefetch = 0 : i64, scratch_operands = 1 : i64, tpu.core_type = #tpu.core_type<tc>, window_params = [{transform_indices = @transform_0, window_bounds = array<i64: 8, 2>}, {transform_indices = @transform_1, window_bounds = array<i64: 3, 2>}, {transform_indices = @transform_2, window_bounds = array<i64: 1, 3>}, {transform_indices = @transform_3, window_bounds = array<i64: 8, 3>}]} {
    %c0_i32 = arith.constant 0 : i32
    %0 = arith.cmpi eq, %arg2, %c0_i32 : i32
    %1 = arith.extui %0 : i1 to i32
    %c0_i32_0 = arith.constant 0 : i32
    %2 = arith.cmpi ne, %1, %c0_i32_0 : i32
    scf.if %2 {
      %c0_10 = arith.constant 0 : index
      %c0_11 = arith.constant 0 : index
      %12 = vector.load %arg5[%c0_10, %c0_11] : memref<1x3xf32, #tpu.memory_space<vmem>>, vector<1x3xf32>
      %13 = vector.shape_cast %12 : vector<1x3xf32> to vector<1x3xf32>
      %14 = vector.broadcast %13 : vector<1x3xf32> to vector<8x3xf32>
      %c0_12 = arith.constant 0 : index
      %c0_13 = arith.constant 0 : index
      %15 = vector.load %arg7[%c0_12, %c0_13] : memref<8x3xf32, #tpu.memory_space<vmem>>, vector<8x3xf32>
      tpu.vector_store %arg7[%c0_12, %c0_13], %14 {strides = array<i32>} : memref<8x3xf32, #tpu.memory_space<vmem>>, vector<8x3xf32>,
    } else {
    }
    %c0 = arith.constant 0 : index
    %c0_1 = arith.constant 0 : index
    %3 = vector.load %arg7[%c0, %c0_1] : memref<8x3xf32, #tpu.memory_space<vmem>>, vector<8x3xf32>
    %c0_2 = arith.constant 0 : index
    %c0_3 = arith.constant 0 : index
    %4 = vector.load %arg3[%c0_2, %c0_3] : memref<8x2xf32, #tpu.memory_space<vmem>>, vector<8x2xf32>
    %c0_4 = arith.constant 0 : index
    %c0_5 = arith.constant 0 : index
    %5 = vector.load %arg4[%c0_4, %c0_5] : memref<3x2xf32, #tpu.memory_space<vmem>>, vector<3x2xf32>
    %cst = arith.constant dense<0.000000e+00> : vector<8x3xf32>
    %6 = tpu.matmul %4, %5, %cst {dimension_numbers = #tpu.dot_dimension_numbers<[1], [1], [0], [0], [0, 0, 1, 0], [], []>} : vector<8x2xf32>, vector<3x2xf32>, vector<8x3xf32> -> vector<8x3xf32>
    %7 = arith.addf %3, %6 : vector<8x3xf32>
    %c0_6 = arith.constant 0 : index
    %c0_7 = arith.constant 0 : index
    %8 = vector.load %arg7[%c0_6, %c0_7] : memref<8x3xf32, #tpu.memory_space<vmem>>, vector<8x3xf32>
    tpu.vector_store %arg7[%c0_6, %c0_7], %7 {strides = array<i32>} : memref<8x3xf32, #tpu.memory_space<vmem>>, vector<8x3xf32>,
    %c0_i32_8 = arith.constant 0 : i32
    %9 = arith.cmpi eq, %arg2, %c0_i32_8 : i32
    %10 = arith.extui %9 : i1 to i32
    %c0_i32_9 = arith.constant 0 : i32
    %11 = arith.cmpi ne, %10, %c0_i32_9 : i32
    scf.if %11 {
      %c0_10 = arith.constant 0 : index
      %c0_11 = arith.constant 0 : index
      %12 = vector.load %arg7[%c0_10, %c0_11] : memref<8x3xf32, #tpu.memory_space<vmem>>, vector<8x3xf32>
      %cst_12 = arith.constant 0.000000e+00 : f32
      %13 = vector.broadcast %cst_12 : f32 to vector<8x3xf32>
      %14 = arith.subf %13, %12 : vector<8x3xf32>
      %15 = math.exp %14 : vector<8x3xf32>
      %cst_13 = arith.constant 1.000000e+00 : f32
      %16 = vector.broadcast %cst_13 : f32 to vector<8x3xf32>
      %17 = arith.addf %16, %15 : vector<8x3xf32>
      %18 = tpu.reciprocal %17 {approx = true} : vector<8x3xf32> -> vector<8x3xf32>
      %c0_14 = arith.constant 0 : index
      %c0_15 = arith.constant 0 : index
      %19 = vector.load %arg6[%c0_14, %c0_15] : memref<8x3xf32, #tpu.memory_space<vmem>>, vector<8x3xf32>
      tpu.vector_store %arg6[%c0_14, %c0_15], %18 {strides = array<i32>} : memref<8x3xf32, #tpu.memory_space<vmem>>, vector<8x3xf32>,
    } else {
    }
    return
  }
  func.func @transform_0(%arg0: i32, %arg1: i32, %arg2: i32) -> (i32, i32) {
    %c0_i32 = arith.constant 0 : i32
    return %arg0, %arg2 : i32, i32
  }
  func.func @transform_1(%arg0: i32, %arg1: i32, %arg2: i32) -> (i32, i32) {
    %c0_i32 = arith.constant 0 : i32
    return %arg1, %arg2 : i32, i32
  }
  func.func @transform_2(%arg0: i32, %arg1: i32, %arg2: i32) -> (i32, i32) {
    %c0_i32 = arith.constant 0 : i32
    %c0_i32_0 = arith.constant 0 : i32
    return %c0_i32, %arg1 : i32, i32
  }
  func.func @transform_3(%arg0: i32, %arg1: i32, %arg2: i32) -> (i32, i32) {
    %c0_i32 = arith.constant 0 : i32
    return %arg0, %arg1 : i32, i32
  }
}

</mosaic_0001>

<bundles_post_ra>
// kernel: tpu_custom_call.1
= control target key start
LH: loop header
LB: loop body
LE: loop exit
PB: predicated region body
PF: predicated region fallthrough
CT: control target
= control target key end

     0   :  { %vm30_vm0 = vcmask 15360   ;;  %vm25_vm1 = vcmask 23552   ;;  %v140_v0 = vmov 0.0   ;;  %vm141_vm2 = vmmov 0   ;;  %s177_s1 = inlined_call_operand.vmem [shape: f32[3,2], index: 1, kind: input, shape index: {}]   ;;  %s178_s0 = inlined_call_operand.vmem [shape: f32[8,2], index: 0, kind: input, shape index: {}]   ;;  %s179_s2 = inlined_call_operand.vmem [shape: f32[1,3], index: 2, kind: input, shape index: {}]   ;;  %s180_s3 = inlined_call_operand.vmem [shape: f32[8,3], index: 3, kind: output, shape index: {}]  }
   0x1   :  { %129 = vmatprep.subr.mxu0 %v140_v0  ;;  %v29_v1 = vld [vmem:[%s177_s1] sm:$0x7]  ;;  %131 = vmatprep.mubr.msk.f32.mxu0 %vm141_vm2, %v140_v0 }
   0x2   :  { %v124_v2 = vld [vmem:[%s179_s2] ss:$0 sm:$0xff]  ;;  %130 = vmatpush3.xpose.msk.msra.mxu0 %vm30_vm0, %v29_v1 }
   0x3   :  { %v28_v3 = vld [vmem:[%s178_s0] sm:$0xff]  ;;  %26 = vst.msk [vmem:[#allocation2] sm:$0xff] %vm25_vm1, %v124_v2 }
   0x5   :  { %132 = vmatmul.mubr.msk.f32.vlgmr.msra.gmra.mrb[0].mxu0 %vm30_vm0, %v28_v3 }
   0xa   :  { %v27_v4 = vld [vmem:[#allocation2] sm:$0xff] }
  0xd8   :  { %v103_v5 = vpop.f32.mrb[0].mxu0 }
  0xd9   :  { %v107_v6 = vadd.f32 %v103_v5, %v27_v4  ;;  %v133_v7 = vpop.f32.mrb[1].mxu0 }
  0xdb   :  { %109 = vst.msk [vmem:[#allocation2] sm:$0xff] %vm25_vm1, %v107_v6 }
  0xe2   :  { %v113_v8 = vld [vmem:[#allocation2] sm:$0xff] }
  0xe3   :  { %v114_v9 = vsub.f32 0.0, %v113_v8 }
  0xe5   :  { %v115_v10 = vmul.f32 1.442695, %v114_v9 }
  0xe7   :  { %136 = vpow2.f32 %v115_v10 }
  0xf1   :  { %v137_v11 = vpop.eup %136 }
  0xf2   :  { %v117_v12 = vadd.f32 1.0, %v137_v11 }
  0xf4   :  { %138 = vrcp.f32 %v117_v12 }
  0xfe   :  { %v139_v13 = vpop.eup %138 }
  0xff   :  { %119 = vst.msk [vmem:[%s180_s3] sm:$0xff] %vm25_vm1, %v139_v13 }

</bundles_post_ra>
